<compile_context>
chip_gen: v7x
topology: tpu7x:2x2x1
jax: 0.10.0
libtpu: 0.0.40
codegen_flags: <defaults>
</compile_context>

<pallas_src>
import functools

import jax
import jax.numpy as jnp
from jax.experimental import pallas as pl
from jax.experimental.pallas import tpu as pltpu


def _round_up(n, m):
    return (n + m - 1) // m * m


def _cdiv(a, b):
    return -(-a // b)


def _has_bf16_valu():
    """bf16 VALU exists on v6e/v7x and newer; not on v5e/v4/v3/v2."""
    kind = jax.devices()[0].device_kind.lower()
    return not any(tag in kind for tag in ("v2", "v3", "v4", "v5"))


def mlp_kernel(x_ref, w1_ref, b1_ref, w2_ref, b2_ref, w3_ref, b3_ref, o_ref,
               *, bf16_epilogue):
    # fc1: cast the streamed activation tile to bf16 in-register; MXU matmul
    # with f32 accumulation (Mosaic pads the 32-deep contraction internally).
    x = x_ref[...].astype(jnp.bfloat16)                       # (TB, K)
    h1 = jnp.dot(x, w1_ref[...], preferred_element_type=jnp.float32)
    h1 = h1 + b1_ref[...]                                     # bias add in f32
    if bf16_epilogue:
        # v6e/v7x: ReLU on packed bf16 vregs (2x VALU throughput).
        h1 = jnp.maximum(h1.astype(jnp.bfloat16), jnp.zeros((), jnp.bfloat16))
    else:
        # v5e and older: no bf16 VALU; keep the epilogue in f32, cast after.
        h1 = jnp.maximum(h1, 0.0).astype(jnp.bfloat16)

    # fc2
    h2 = jnp.dot(h1, w2_ref[...], preferred_element_type=jnp.float32)
    h2 = h2 + b2_ref[...]
    if bf16_epilogue:
        h2 = jnp.maximum(h2.astype(jnp.bfloat16), jnp.zeros((), jnp.bfloat16))
    else:
        h2 = jnp.maximum(h2, 0.0).astype(jnp.bfloat16)

    # fc3: standard-form bf16 MXU matmul (TB,256)@(256,1) -> (TB,1), f32 acc.
    q = jnp.dot(h2, w3_ref[...], preferred_element_type=jnp.float32)
    o_ref[...] = (q + b3_ref[...]).astype(o_ref.dtype)


@functools.partial(jax.jit, static_argnames=("block_b", "bf16_epilogue"))
def _forward(x, w1, b1, w2, b2, w3, b3, *, block_b, bf16_epilogue):
    B, K = x.shape
    F1 = w1.shape[1]
    F2 = w2.shape[1]

    # Batch tile selection: large (amortize per-step overhead), never larger
    # than needed, and split into >= 2 tiles when possible so both TensorCores
    # on v7x get work via the "parallel" batch axis.
    block_b = _round_up(max(int(block_b), 128), 128)
    TB = min(block_b, _round_up(B, 8))
    if B > 128:
        TB = min(TB, _round_up(_cdiv(B, 2), 128))
    TB = max(8, _round_up(TB, 8))
    grid_b = _cdiv(B, TB)

    def resident(shape):
        # Constant block index => DMA'd once, stays VMEM-resident across tiles.
        return pl.BlockSpec(shape, lambda i: (0, 0))

    kernel = functools.partial(mlp_kernel, bf16_epilogue=bf16_epilogue)

    out = pl.pallas_call(
        kernel,
        out_shape=jax.ShapeDtypeStruct((B, 1), jnp.float32),
        grid=(grid_b,),
        in_specs=[
            pl.BlockSpec((TB, K), lambda i: (i, 0)),   # x streamed per batch tile
            resident((K, F1)), resident((1, F1)),      # fc1 weight / bias
            resident((F1, F2)), resident((1, F2)),     # fc2 weight / bias
            resident((F2, 1)), resident((1, 1)),       # fc3 weight / bias
        ],
        out_specs=pl.BlockSpec((TB, 1), lambda i: (i, 0)),
        compiler_params=pltpu.CompilerParams(
            dimension_semantics=("parallel",),         # 2-TC sharding on v7x
        ),
    )(
        x,
        w1.astype(jnp.bfloat16), b1.reshape(1, F1).astype(jnp.float32),
        w2.astype(jnp.bfloat16), b2.reshape(1, F2).astype(jnp.float32),
        w3.reshape(F2, 1).astype(jnp.bfloat16), b3.reshape(1, 1).astype(jnp.float32),
    )
    return out


def action_value_network(x, w1, b1, w2, b2, w3, b3, *, block_b=2048,
                         bf16_epilogue=None):
    """Critic MLP forward pass.

    x:  (B, input_dims) float32
    w1: (input_dims, F1), b1: (F1,)   (weights stored pre-transposed: (in, out))
    w2: (F1, F2),         b2: (F2,)
    w3: (F2, 1),          b3: (1,)
    returns (B, 1) float32
    """
    if bf16_epilogue is None:
        bf16_epilogue = _has_bf16_valu()
    return _forward(x, w1, b1, w2, b2, w3, b3,
                    block_b=int(block_b), bf16_epilogue=bool(bf16_epilogue))


def init_linear_params(key, fan_in, fan_out):
    """PyTorch-style uniform(-1/sqrt(fan_in), 1/sqrt(fan_in)) init.
    Weight returned pre-transposed as (fan_in, fan_out); bias as (fan_out,)."""
    kw, kb = jax.random.split(key)
    bound = 1.0 / jnp.sqrt(jnp.float32(fan_in))
    w = jax.random.uniform(kw, (fan_in, fan_out), jnp.float32, -bound, bound)
    b = jax.random.uniform(kb, (fan_out,), jnp.float32, -bound, bound)
    return w, b


if __name__ == "__main__":
    input_dims = 32
    fc1_dims = 256
    fc2_dims = 256
    batch = 8

    key = jax.random.PRNGKey(0)
    kx, k1, k2, k3 = jax.random.split(key, 4)

    x = jax.random.normal(kx, (batch, input_dims), jnp.float32)
    w1, b1 = init_linear_params(k1, input_dims, fc1_dims)
    w2, b2 = init_linear_params(k2, fc1_dims, fc2_dims)
    w3, b3 = init_linear_params(k3, fc2_dims, 1)

    out = action_value_network(x, w1, b1, w2, b2, w3, b3)
    out = jax.block_until_ready(out)

    # Pure-JAX f32 reference. The kernel uses bf16 MXU inputs with f32
    # accumulation, so compare with a bf16-appropriate tolerance.
    h1 = jnp.maximum(x @ w1 + b1[None, :], 0.0)
    h2 = jnp.maximum(h1 @ w2 + b2[None, :], 0.0)
    ref = h2 @ w3 + b3[None, :]

    assert out.shape == (batch, 1)
    assert jnp.allclose(out, ref, atol=2e-2, rtol=2e-2), float(jnp.max(jnp.abs(out - ref)))

    print("KERNEL_OK")
</pallas_src>

<mosaic_0001>
module attributes {stable_mosaic.version = 11 : i64} {
  func.func @mlp_kernel(%arg0: i32, %arg1: memref<8x32xf32, #tpu.memory_space<vmem>>, %arg2: memref<32x256xbf16, #tpu.memory_space<vmem>>, %arg3: memref<1x256xf32, #tpu.memory_space<vmem>>, %arg4: memref<256x256xbf16, #tpu.memory_space<vmem>>, %arg5: memref<1x256xf32, #tpu.memory_space<vmem>>, %arg6: memref<256x1xbf16, #tpu.memory_space<vmem>>, %arg7: memref<1x1xf32, #tpu.memory_space<vmem>>, %arg8: memref<8x1xf32, #tpu.memory_space<vmem>>) attributes {dimension_semantics = [#tpu.dimension_semantics<parallel>], iteration_bounds = array<i64: 1>, scalar_prefetch = 0 : i64, scratch_operands = 0 : i64, tpu.core_type = #tpu.core_type<tc>, window_params = [{transform_indices = @transform_0, window_bounds = array<i64: 8, 32>}, {pipeline_mode = #tpu.pipeline_mode<synchronous>, transform_indices = @transform_1, window_bounds = array<i64: 32, 256>}, {pipeline_mode = #tpu.pipeline_mode<synchronous>, transform_indices = @transform_2, window_bounds = array<i64: 1, 256>}, {pipeline_mode = #tpu.pipeline_mode<synchronous>, transform_indices = @transform_3, window_bounds = array<i64: 256, 256>}, {pipeline_mode = #tpu.pipeline_mode<synchronous>, transform_indices = @transform_4, window_bounds = array<i64: 1, 256>}, {pipeline_mode = #tpu.pipeline_mode<synchronous>, transform_indices = @transform_5, window_bounds = array<i64: 256, 1>}, {pipeline_mode = #tpu.pipeline_mode<synchronous>, transform_indices = @transform_6, window_bounds = array<i64: 1, 1>}, {transform_indices = @transform_7, window_bounds = array<i64: 8, 1>}]} {
    %c0 = arith.constant 0 : index
    %c0_0 = arith.constant 0 : index
    %0 = vector.load %arg1[%c0, %c0_0] : memref<8x32xf32, #tpu.memory_space<vmem>>, vector<8x32xf32>
    %1 = arith.truncf %0 : vector<8x32xf32> to vector<8x32xbf16>
    %c0_1 = arith.constant 0 : index
    %c0_2 = arith.constant 0 : index
    %2 = vector.load %arg2[%c0_1, %c0_2] : memref<32x256xbf16, #tpu.memory_space<vmem>>, vector<32x256xbf16>
    %cst = arith.constant dense<0.000000e+00> : vector<8x256xf32>
    %3 = tpu.matmul %1, %2, %cst {dimension_numbers = #tpu.dot_dimension_numbers<[1], [0], [0], [1], [0, 0, 1, 1], [], []>} : vector<8x32xbf16>, vector<32x256xbf16>, vector<8x256xf32> -> vector<8x256xf32>
    %c0_3 = arith.constant 0 : index
    %c0_4 = arith.constant 0 : index
    %4 = vector.load %arg3[%c0_3, %c0_4] : memref<1x256xf32, #tpu.memory_space<vmem>>, vector<1x256xf32>
    %5 = vector.broadcast %4 : vector<1x256xf32> to vector<8x256xf32>
    %6 = arith.addf %3, %5 : vector<8x256xf32>
    %7 = arith.truncf %6 : vector<8x256xf32> to vector<8x256xbf16>
    %cst_5 = arith.constant 0.000000e+00 : bf16
    %8 = vector.broadcast %cst_5 : bf16 to vector<8x256xbf16>
    %9 = arith.maximumf %7, %8 : vector<8x256xbf16>
    %c0_6 = arith.constant 0 : index
    %c0_7 = arith.constant 0 : index
    %10 = vector.load %arg4[%c0_6, %c0_7] : memref<256x256xbf16, #tpu.memory_space<vmem>>, vector<256x256xbf16>
    %cst_8 = arith.constant dense<0.000000e+00> : vector<8x256xf32>
    %11 = tpu.matmul %9, %10, %cst_8 {dimension_numbers = #tpu.dot_dimension_numbers<[1], [0], [0], [1], [0, 0, 1, 1], [], []>} : vector<8x256xbf16>, vector<256x256xbf16>, vector<8x256xf32> -> vector<8x256xf32>
    %c0_9 = arith.constant 0 : index
    %c0_10 = arith.constant 0 : index
    %12 = vector.load %arg5[%c0_9, %c0_10] : memref<1x256xf32, #tpu.memory_space<vmem>>, vector<1x256xf32>
    %13 = vector.broadcast %12 : vector<1x256xf32> to vector<8x256xf32>
    %14 = arith.addf %11, %13 : vector<8x256xf32>
    %15 = arith.truncf %14 : vector<8x256xf32> to vector<8x256xbf16>
    %cst_11 = arith.constant 0.000000e+00 : bf16
    %16 = vector.broadcast %cst_11 : bf16 to vector<8x256xbf16>
    %17 = arith.maximumf %15, %16 : vector<8x256xbf16>
    %c0_12 = arith.constant 0 : index
    %c0_13 = arith.constant 0 : index
    %18 = vector.load %arg6[%c0_12, %c0_13] : memref<256x1xbf16, #tpu.memory_space<vmem>>, vector<256x1xbf16>
    %cst_14 = arith.constant dense<0.000000e+00> : vector<8x1xf32>
    %19 = tpu.matmul %17, %18, %cst_14 {dimension_numbers = #tpu.dot_dimension_numbers<[1], [0], [0], [1], [0, 0, 1, 1], [], []>} : vector<8x256xbf16>, vector<256x1xbf16>, vector<8x1xf32> -> vector<8x1xf32>
    %c0_15 = arith.constant 0 : index
    %c0_16 = arith.constant 0 : index
    %20 = vector.load %arg7[%c0_15, %c0_16] : memref<1x1xf32, #tpu.memory_space<vmem>>, vector<1x1xf32>
    %21 = vector.broadcast %20 : vector<1x1xf32> to vector<8x1xf32>
    %22 = arith.addf %19, %21 : vector<8x1xf32>
    %c0_17 = arith.constant 0 : index
    %c0_18 = arith.constant 0 : index
    %23 = vector.load %arg8[%c0_17, %c0_18] : memref<8x1xf32, #tpu.memory_space<vmem>>, vector<8x1xf32>
    tpu.vector_store %arg8[%c0_17, %c0_18], %22 {strides = array<i32>} : memref<8x1xf32, #tpu.memory_space<vmem>>, vector<8x1xf32>,
    return
  }
  func.func @transform_0(%arg0: i32) -> (i32, i32) {
    %c0_i32 = arith.constant 0 : i32
    %c0_i32_0 = arith.constant 0 : i32
    return %arg0, %c0_i32 : i32, i32
  }
  func.func @transform_1(%arg0: i32) -> (i32, i32) {
    %c0_i32 = arith.constant 0 : i32
    %c0_i32_0 = arith.constant 0 : i32
    %c0_i32_1 = arith.constant 0 : i32
    return %c0_i32, %c0_i32_0 : i32, i32
  }
  func.func @transform_2(%arg0: i32) -> (i32, i32) {
    %c0_i32 = arith.constant 0 : i32
    %c0_i32_0 = arith.constant 0 : i32
    %c0_i32_1 = arith.constant 0 : i32
    return %c0_i32, %c0_i32_0 : i32, i32
  }
  func.func @transform_3(%arg0: i32) -> (i32, i32) {
    %c0_i32 = arith.constant 0 : i32
    %c0_i32_0 = arith.constant 0 : i32
    %c0_i32_1 = arith.constant 0 : i32
    return %c0_i32, %c0_i32_0 : i32, i32
  }
  func.func @transform_4(%arg0: i32) -> (i32, i32) {
    %c0_i32 = arith.constant 0 : i32
    %c0_i32_0 = arith.constant 0 : i32
    %c0_i32_1 = arith.constant 0 : i32
    return %c0_i32, %c0_i32_0 : i32, i32
  }
  func.func @transform_5(%arg0: i32) -> (i32, i32) {
    %c0_i32 = arith.constant 0 : i32
    %c0_i32_0 = arith.constant 0 : i32
    %c0_i32_1 = arith.constant 0 : i32
    return %c0_i32, %c0_i32_0 : i32, i32
  }
  func.func @transform_6(%arg0: i32) -> (i32, i32) {
    %c0_i32 = arith.constant 0 : i32
    %c0_i32_0 = arith.constant 0 : i32
    %c0_i32_1 = arith.constant 0 : i32
    return %c0_i32, %c0_i32_0 : i32, i32
  }
  func.func @transform_7(%arg0: i32) -> (i32, i32) {
    %c0_i32 = arith.constant 0 : i32
    %c0_i32_0 = arith.constant 0 : i32
    return %arg0, %c0_i32 : i32, i32
  }
}

</mosaic_0001>

<bundles_post_ra>
// kernel: _forward.1
= control target key start
LH: loop header
LB: loop body
LE: loop exit
PB: predicated region body
PF: predicated region fallthrough
CT: control target
= control target key end

     0   :  { %v693_v1 = vmov 0   ;;  %vm67_vm0 = vcmask 261120   ;;  %v37_v51 = vlaneseq  ;;  %vm540_vm1 = vcmask 7168   ;;  %s910_s1 = inlined_call_operand.vmem [shape: bf16[32,256], index: 1, kind: input, shape index: {}]   ;;  %s911_s0 = inlined_call_operand.vmem [shape: f32[8,32], index: 0, kind: input, shape index: {}]   ;;  %s912_s3 = inlined_call_operand.vmem [shape: bf16[256,256], index: 3, kind: input, shape index: {}]   ;;  %s913_s5 = inlined_call_operand.vmem [shape: bf16[256,1], index: 5, kind: input, shape index: {}]   ;;  %s914_s2 = inlined_call_operand.vmem [shape: f32[1,256], index: 2, kind: input, shape index: {}]   ;;  %s915_s4 = inlined_call_operand.vmem [shape: f32[1,256], index: 4, kind: input, shape index: {}]   ;;  %s916_s6 = inlined_call_operand.<no memory space> [shape: f32[1,1], index: 6, kind: input, shape index: {}]   ;;  %s917_s7 = inlined_call_operand.vmem [shape: f32[8,1], index: 7, kind: output, shape index: {}]  }
   0x1   :  { %v623_v0 = vld [vmem:[%s910_s1 + $0x4] ss:$8 sps:$4 sm:$0xff]   ;;  %103 = vmatprep.mubr.bf16.mxu0 %v693_v1  ;;  %v625_v2 = vld [vmem:[%s910_s1] ss:$8 sps:$4 sm:$0xff]   ;;  %v626_v3 = vld [vmem:[%s910_s1 + $0x14] ss:$8 sps:$4 sm:$0xff]  }
   0x2   :  { %71 = vmatprep.subr.bf16.mxu0 %v623_v0  ;;  %v628_v4 = vld [vmem:[%s910_s1 + $0x10] ss:$8 sps:$4 sm:$0xff]   ;;  %v29_v5 = vld [vmem:[%s911_s0] sm:$0xff]  ;;  %v632_v8 = vld [vmem:[%s912_s3 + $0x14] ss:$8 sps:$4 sm:$0xff]   ;;  %v38_v52 = vshrl.u32 %v37_v51, 7 }
   0x3   :  { %72 = vmatpush1.bf16.msra.mxu0 %v625_v2  ;;  %v629_v6 = vld [vmem:[%s912_s3 + $0x4] ss:$8 sps:$4 sm:$0xff]   ;;  %v631_v7 = vld [vmem:[%s912_s3] ss:$8 sps:$4 sm:$0xff]   ;;  %v30_v9 = vpack.c.bf16 %v29_v5, %v29_v5  ;;  %v634_v10 = vld [vmem:[%s912_s3 + $0x10] ss:$8 sps:$4 sm:$0xff]  }
   0x4   :  { %73 = vmatprep.subr.bf16.mxu0 %v626_v3  ;;  %320 = vmatprep.subr.bf16.mxu1 %v629_v6  ;;  %v635_v11 = vld [vmem:[%s912_s3 + $0x24] ss:$8 sps:$4 sm:$0xff]   ;;  %v637_v12 = vld [vmem:[%s912_s3 + $0x20] ss:$8 sps:$4 sm:$0xff]   ;;  %v638_v13 = vld [vmem:[%s912_s3 + $0x34] ss:$8 sps:$4 sm:$0xff]  }
   0x5   :  { %321 = vmatpush1.bf16.msra.mxu1 %v631_v7  ;;  %v640_v14 = vld [vmem:[%s912_s3 + $0x30] ss:$8 sps:$4 sm:$0xff]   ;;  %v641_v15 = vld [vmem:[%s912_s3 + $0x44] ss:$8 sps:$4 sm:$0xff]   ;;  %v643_v16 = vld [vmem:[%s912_s3 + $0x40] ss:$8 sps:$4 sm:$0xff]  }
   0x6   :  { %322 = vmatprep.subr.bf16.mxu1 %v632_v8  ;;  %v644_v17 = vld [vmem:[%s912_s3 + $0x54] ss:$8 sps:$4 sm:$0xff]   ;;  %v646_v18 = vld [vmem:[%s912_s3 + $0x50] ss:$8 sps:$4 sm:$0xff]   ;;  %v647_v19 = vld [vmem:[%s912_s3 + $0x64] ss:$8 sps:$4 sm:$0xff]  }
   0x7   :  { %74 = vmatpush1.bf16.msra.mxu0 %v628_v4  ;;  %v649_v20 = vld [vmem:[%s912_s3 + $0x60] ss:$8 sps:$4 sm:$0xff]   ;;  %v650_v21 = vld [vmem:[%s912_s3 + $0x74] ss:$8 sps:$4 sm:$0xff]   ;;  %v652_v22 = vld [vmem:[%s912_s3 + $0x70] ss:$8 sps:$4 sm:$0xff]  }
   0x8   :  { %v653_v23 = vld [vmem:[%s912_s3 + $0x84] ss:$8 sps:$4 sm:$0xff]   ;;  %v655_v24 = vld [vmem:[%s912_s3 + $0x80] ss:$8 sps:$4 sm:$0xff]   ;;  %v656_v25 = vld [vmem:[%s912_s3 + $0x94] ss:$8 sps:$4 sm:$0xff]  }
   0x9   :  { %323 = vmatpush1.bf16.msra.mxu1 %v634_v10  ;;  %v658_v26 = vld [vmem:[%s912_s3 + $0x90] ss:$8 sps:$4 sm:$0xff]   ;;  %v659_v27 = vld [vmem:[%s912_s3 + $0xa4] ss:$8 sps:$4 sm:$0xff]   ;;  %v661_v28 = vld [vmem:[%s912_s3 + $0xa0] ss:$8 sps:$4 sm:$0xff]  }
   0xa   :  { %550 = vmatmul.mubr.msk.bf16.vlgmr.msra.gmra.mrb[0].mxu0 %vm67_vm0, %v30_v9  ;;  %324 = vmatprep.subr.bf16.mxu1 %v635_v11  ;;  %v662_v29 = vld [vmem:[%s912_s3 + $0xb4] ss:$8 sps:$4 sm:$0xff]   ;;  %v664_v30 = vld [vmem:[%s912_s3 + $0xb0] ss:$8 sps:$4 sm:$0xff]   ;;  %v665_v31 = vld [vmem:[%s912_s3 + $0xc4] ss:$8 sps:$4 sm:$0xff]  }
   0xb   :  { %v667_v32 = vld [vmem:[%s912_s3 + $0xc0] ss:$8 sps:$4 sm:$0xff]   ;;  %v668_v33 = vld [vmem:[%s912_s3 + $0xd4] ss:$8 sps:$4 sm:$0xff]   ;;  %v670_v34 = vld [vmem:[%s912_s3 + $0xd0] ss:$8 sps:$4 sm:$0xff]  }
   0xc   :  { %v671_v35 = vld [vmem:[%s912_s3 + $0xe4] ss:$8 sps:$4 sm:$0xff]   ;;  %v673_v36 = vld [vmem:[%s912_s3 + $0xe0] ss:$8 sps:$4 sm:$0xff]   ;;  %v674_v37 = vld [vmem:[%s912_s3 + $0xf4] ss:$8 sps:$4 sm:$0xff]  }
   0xd   :  { %325 = vmatpush1.bf16.msra.mxu1 %v637_v12  ;;  %v676_v38 = vld [vmem:[%s912_s3 + $0xf0] ss:$8 sps:$4 sm:$0xff]   ;;  %v677_v39 = vld [vmem:[%s913_s5 + $0x40] sm:$0xff]   ;;  %v679_v41 = vld [vmem:[%s913_s5 + $0x48] sm:$0xff]   ;;  %v39_v53 = vsub.s32 0, %v38_v52  ;;  %v43_v55 = vsub.s32 1, %v38_v52 }
   0xe   :  { %326 = vmatprep.subr.bf16.mxu1 %v638_v13  ;;  %v678_v40 = vld [vmem:[%s913_s5] sm:$0xff]   ;;  %600 = vmatprep.subr.bf16.mxu0 %v677_v39  ;;  %v680_v42 = vld [vmem:[%s913_s5 + $0x8] sm:$0xff]   ;;  %v681_v43 = vld [vmem:[%s913_s5 + $0x50] sm:$0xff]  }
   0xf   :  { %601 = vmatpush3.bf16.msra.mxu0 %v678_v40  ;;  %v682_v44 = vld [vmem:[%s913_s5 + $0x10] sm:$0xff]   ;;  %v683_v45 = vld [vmem:[%s913_s5 + $0x58] sm:$0xff]   ;;  %v685_v47 = vld [vmem:[%s913_s5 + $0x60] sm:$0xff]  }
  0x10   :  { %602 = vmatprep.subr.bf16.mxu0 %v679_v41  ;;  %v684_v46 = vld [vmem:[%s913_s5 + $0x18] sm:$0xff]   ;;  %v686_v48 = vld [vmem:[%s913_s5 + $0x20] sm:$0xff]   ;;  %v687_v49 = vld [vmem:[%s913_s5 + $0x68] sm:$0xff]  }
  0x11   :  { %327 = vmatpush1.bf16.msra.mxu1 %v640_v14  ;;  %v688_v50 = vld [vmem:[%s913_s5 + $0x28] sm:$0xff]   ;;  %v35_v54 = vld [vmem:[%s914_s2] sm:$0x3]  ;;  %v689_v5 = vld [vmem:[%s913_s5 + $0x70] sm:$0xff]  }
  0x12   :  { %328 = vmatprep.subr.bf16.mxu1 %v641_v15  ;;  %v40_v56 = vrot.slane %v35_v54, %v39_v53  ;;  %v44_v57 = vrot.slane %v35_v54, %v43_v55  ;;  %v690_v6 = vld [vmem:[%s913_s5 + $0x30] sm:$0xff]   ;;  %v691_v7 = vld [vmem:[%s913_s5 + $0x78] sm:$0xff]   ;;  %v148_v9 = vld [vmem:[%s915_s4] sm:$0x3] }
  0x13   :  { %603 = vmatpush3.bf16.msra.mxu0 %v680_v42  ;;  %v692_v8 = vld [vmem:[%s913_s5 + $0x38] sm:$0xff]   ;;  %v153_v10 = vrot.slane %v148_v9, %v39_v53  ;;  %v157_v11 = vrot.slane %v148_v9, %v43_v55 }
  0x14   :  { %604 = vmatprep.subr.bf16.mxu0 %v681_v43 }
  0x15   :  { %329 = vmatpush1.bf16.msra.mxu1 %v643_v16 }
  0x16   :  { %330 = vmatprep.subr.bf16.mxu1 %v644_v17 }
  0x17   :  { %605 = vmatpush3.bf16.msra.mxu0 %v682_v44 }
  0x18   :  { %606 = vmatprep.subr.bf16.mxu0 %v683_v45 }
  0x19   :  { %331 = vmatpush1.bf16.msra.mxu1 %v646_v18 }
  0x1a   :  { %332 = vmatprep.subr.bf16.mxu1 %v647_v19 }
  0x1b   :  { %607 = vmatpush3.bf16.msra.mxu0 %v684_v46 }
  0x1c   :  { %608 = vmatprep.subr.bf16.mxu0 %v685_v47 }
  0x1d   :  { %333 = vmatpush1.bf16.msra.mxu1 %v649_v20 }
  0x1e   :  { %334 = vmatprep.subr.bf16.mxu1 %v650_v21 }
  0x1f   :  { %609 = vmatpush3.bf16.msra.mxu0 %v686_v48 }
  0x20   :  { %610 = vmatprep.subr.bf16.mxu0 %v687_v49 }
  0x21   :  { %335 = vmatpush1.bf16.msra.mxu1 %v652_v22  ;;  %v12_v22 = vstv %s916_s6 }
  0x22   :  { %336 = vmatprep.subr.bf16.mxu1 %v653_v23  ;;  %13 = vst [vmem:[#allocation2] sm:$0x1] %v12_v22 }
  0x23   :  { %611 = vmatpush3.bf16.msra.mxu0 %v688_v50 }
  0x24   :  { %612 = vmatprep.subr.bf16.mxu0 %v689_v5 }
  0x25   :  { %337 = vmatpush1.bf16.msra.mxu1 %v655_v24 }
  0x26   :  { %338 = vmatprep.subr.bf16.mxu1 %v656_v25 }
  0x27   :  { %613 = vmatpush3.bf16.msra.mxu0 %v690_v6 }
  0x28   :  { %614 = vmatprep.subr.bf16.mxu0 %v691_v7 }
  0x29   :  { %339 = vmatpush1.bf16.msra.mxu1 %v658_v26  ;;  %v583_v24 = vld [vmem:[#allocation2] ss:$0 sm:$0xff] }
  0x2a   :  { %340 = vmatprep.subr.bf16.mxu1 %v659_v27 }
  0x2b   :  { %615 = vmatpush3.bf16.msra.mxu0 %v692_v8 }
  0x2d   :  { %341 = vmatpush1.bf16.msra.mxu1 %v661_v28 }
  0x2e   :  { %342 = vmatprep.subr.bf16.mxu1 %v662_v29 }
  0x31   :  { %343 = vmatpush1.bf16.msra.mxu1 %v664_v30 }
  0x32   :  { %344 = vmatprep.subr.bf16.mxu1 %v665_v31 }
  0x35   :  { %345 = vmatpush1.bf16.msra.mxu1 %v667_v32 }
  0x36   :  { %346 = vmatprep.subr.bf16.mxu1 %v668_v33 }
  0x39   :  { %347 = vmatpush1.bf16.msra.mxu1 %v670_v34 }
  0x3a   :  { %348 = vmatprep.subr.bf16.mxu1 %v671_v35 }
  0x3d   :  { %349 = vmatpush1.bf16.msra.mxu1 %v673_v36 }
  0x3e   :  { %350 = vmatprep.subr.bf16.mxu1 %v674_v37 }
  0x41   :  { %351 = vmatpush1.bf16.msra.mxu1 %v676_v38 }
  0xdd   :  { %v105_v58 = vpop.f32.mrb[0].mxu0 }
  0xde   :  { %v106_v59 = vadd.f32 %v105_v58, %v40_v56  ;;  %v107_v60 = vpop.f32.mrb[1].mxu0 }
  0xdf   :  { %v108_v61 = vadd.f32 %v107_v60, %v44_v57  ;;  %v109_v62 = vpop.f32.mrb[2].mxu0 }
  0xe0   :  { %v112_v63 = vpack.c.bf16 %v106_v59, %v106_v59  ;;  %v110_v0 = vpop.f32.mrb[3].mxu0 }
  0xe1   :  { %v113_v2 = vpack.c.bf16 %v108_v61, %v108_v61 }
  0xe2   :  { %v114_v4 = vmax.bf16 %v693_v1, %v112_v63 }
  0xe3   :  { %v115_v3 = vmax.bf16 %v693_v1, %v113_v2 }
  0xe5   :  { %352 = vmatprep.mubr.bf16.mxu1 %v115_v3 }
  0xe6   :  { %353 = vmatmul.mubr.bf16.vlgmr.msra.gmra.mrb[0].mxu1 %v114_v4 }
 0x1b9   :  { %v354_v12 = vpop.f32.mrb[0].mxu1 }
 0x1ba   :  { %v355_v13 = vadd.f32 %v354_v12, %v153_v10  ;;  %v356_v14 = vpop.f32.mrb[1].mxu1 }
 0x1bb   :  { %v357_v15 = vadd.f32 %v356_v14, %v157_v11  ;;  %v358_v16 = vpop.f32.mrb[2].mxu1 }
 0x1bc   :  { %v361_v17 = vpack.c.bf16 %v355_v13, %v355_v13  ;;  %v359_v18 = vpop.f32.mrb[3].mxu1 }
 0x1bd   :  { %v362_v19 = vpack.c.bf16 %v357_v15, %v357_v15 }
 0x1be   :  { %v363_v21 = vmax.bf16 %v693_v1, %v361_v17 }
 0x1bf   :  { %v364_v20 = vmax.bf16 %v693_v1, %v362_v19 }
 0x1c1   :  { %532 = vmatprep.mubr.bf16.mxu0 %v364_v20 }
 0x1c2   :  { %533 = vmatmul.mubr.bf16.vlgmr.msra.gmra.mrb[4].mxu0 %v363_v21 }
 0x295   :  { %v616_v23 = vpop.f32.mrb[4].mxu0 }
 0x296   :  { %v617_v25 = vpop.f32.mrb[5].mxu0 }
 0x297   :  { %v618_v26 = vadd.f32 %v617_v25, %v616_v23  ;;  %v619_v27 = vpop.f32.mrb[6].mxu0 }
 0x298   :  { %v620_v28 = vpop.f32.mrb[7].mxu0 }
 0x299   :  { %v535_v29 = vadd.f32 %v618_v26, %v583_v24 }
 0x29b   :  { %541 = vst.msk [vmem:[%s917_s7] sm:$0xff] %vm540_vm1, %v535_v29 }

</bundles_post_ra>
